<compile_context>
chip_gen: v6e
topology: v6e:2x2x1
jax: 0.10.0
libtpu: 0.0.40
codegen_flags: <defaults>
</compile_context>

<pallas_src>
import functools

import jax
import jax.numpy as jnp
from jax.experimental import pallas as pl
from jax.experimental.pallas import tpu as pltpu

HIGHEST = jax.lax.Precision.HIGHEST   # used only by the fp32 reference
LANE = 128


def _predictor_kernel(B, T, T_pad, H, K, pad, eps,
                      t_pos_ref, x_ref,
                      w1_ref, g1_ref, be1_ref,
                      w2_ref, g2_ref, be2_ref,
                      wh_ref, bh_ref, out_ref):
    """t_pos: (B*T_pad, 1) int32 within-sequence index; x: (B*T_pad, Din);
    w1: (K, Din, H); w2: (K, H, H); g*/be*: (1, H); wh: (H, 128) fused,
    zero-padded head weight; bh: (1, 128); out: (B*T_pad, 128)."""
    n_rows = B * T_pad
    inv_n = 1.0 / float(B * T)          # BN statistics over the real rows only
    t_pos = t_pos_ref[...]              # (n_rows, 1)

    def conv(h, w_ref):
        # Stride-1, padding=K//2 Conv1d as K accumulated MXU matmuls on rolled
        # rows.  pltpu.roll is an XLU sublane rotate (otherwise-idle slot); the
        # per-tap mask zeroes taps that would read across the sequence edge,
        # the batch boundary, or the sublane-padding rows.
        acc = None
        for k in range(K):
            off = k - pad                              # source row = dest + off
            if off == 0:
                src = h
            else:
                src = pltpu.roll(h, (-off) % n_rows, 0)   # row r now holds h[r+off]
                ok = (t_pos + off >= 0) & (t_pos + off < T)
                src = jnp.where(ok, src, 0.0)
            term = jnp.dot(src, w_ref[k], preferred_element_type=jnp.float32)
            acc = term if acc is None else acc + term
        if T_pad != T:                                 # keep sublane-pad rows at 0
            acc = jnp.where(t_pos < T, acc, 0.0)
        return acc

    def batchnorm(h, g_ref, b_ref):
        # Training-mode BatchNorm1d: biased batch stats over the B*T real rows
        # (pad rows are zero and excluded via inv_n), single pass with clamped
        # variance, affine folded into one scale/shift FMA.
        mean = jnp.sum(h, axis=0, keepdims=True) * inv_n
        var = jnp.maximum(
            jnp.sum(h * h, axis=0, keepdims=True) * inv_n - mean * mean, 0.0)
        scale = jax.lax.rsqrt(var + eps) * g_ref[...]
        return h * scale + (b_ref[...] - mean * scale)

    h1 = batchnorm(conv(x_ref[...], w1_ref), g1_ref, be1_ref)   # (n_rows, H)
    h2 = batchnorm(conv(h1, w2_ref), g2_ref, be2_ref)           # (n_rows, H)

    # Fused linear heads: one (n_rows, H) @ (H, 128) matmul, one lane-dense store.
    out_ref[...] = (jnp.dot(h2, wh_ref[...], preferred_element_type=jnp.float32)
                    + bh_ref[...])


def predictor_forward(x, params, ker):
    """x: (B, T, input_dim) f32.  Returns (text_out (B,T,Ct), bd_out (B,T,2)).

    NOTE: BatchNorm uses per-call batch statistics (the PyTorch module's default
    training-mode behaviour right after __init__), not running stats."""
    B, T, Din = x.shape
    K, _, H = params['w1'].shape
    assert K == ker
    pad = ker // 2
    Ct = params['wt'].shape[1]
    Cout = Ct + 2
    assert Cout <= LANE

    # Sublane-align the row dimension: pad T up to a multiple of 8 (f32 rows).
    T_pad = -(-T // 8) * 8
    if T_pad != T:
        x = jnp.pad(x, ((0, 0), (0, T_pad - T), (0, 0)))
    n_rows = B * T_pad
    x2d = x.reshape(n_rows, Din)

    # Per-row within-sequence index (built host-side; avoids in-kernel int rem).
    t_pos = jnp.tile(jnp.arange(T_pad, dtype=jnp.int32), B).reshape(n_rows, 1)

    # Fused heads, zero-padded to 128 lanes for an unmasked lane-dense store.
    wh = jnp.zeros((H, LANE), jnp.float32)
    wh = wh.at[:, :Ct].set(params['wt']).at[:, Ct:Cout].set(params['wb'])
    bh = jnp.zeros((1, LANE), jnp.float32)
    bh = bh.at[:, :Ct].set(params['bt']).at[:, Ct:Cout].set(params['bb'])

    kernel = functools.partial(_predictor_kernel, B, T, T_pad, H, K, pad, 1e-5)
    vmem = pl.BlockSpec(memory_space=pltpu.MemorySpace.VMEM)

    flops = 2 * n_rows * (K * Din * H + K * H * H + H * LANE)
    bytes_accessed = 4 * (n_rows * (Din + 1 + LANE)
                          + K * Din * H + K * H * H
                          + H * LANE + 2 * LANE + 4 * H)

    out = pl.pallas_call(
        kernel,
        out_shape=jax.ShapeDtypeStruct((n_rows, LANE), jnp.float32),
        in_specs=[vmem] * 10,
        out_specs=vmem,
        compiler_params=pltpu.CompilerParams(
            vmem_limit_bytes=32 * 1024 * 1024),
        cost_estimate=pl.CostEstimate(flops=flops, transcendentals=2 * H,
                                      bytes_accessed=bytes_accessed),
    )(t_pos, x2d, params['w1'], params['g1'], params['b1'],
      params['w2'], params['g2'], params['b2'], wh, bh)

    out = out.reshape(B, T_pad, LANE)[:, :T, :Cout]
    return out[..., :Ct], out[..., Ct:]


def reference_forward(x, params, ker):
    """Pure-JAX fp32 (HIGHEST precision) reference with identical semantics."""
    pad = ker // 2
    eps = 1e-5
    h = x
    for w, g, b in ((params['w1'], params['g1'], params['b1']),
                    (params['w2'], params['g2'], params['b2'])):
        K = w.shape[0]
        T = h.shape[1]
        hp = jnp.pad(h, ((0, 0), (pad, pad), (0, 0)))
        y = sum(jnp.einsum('btd,dh->bth', hp[:, k:k + T, :], w[k],
                           precision=HIGHEST) for k in range(K))
        mean = jnp.mean(y, axis=(0, 1), keepdims=True)
        var = jnp.mean((y - mean) ** 2, axis=(0, 1), keepdims=True)
        h = (y - mean) / jnp.sqrt(var + eps) * g.reshape(1, 1, -1) + b.reshape(1, 1, -1)
    text = (jnp.einsum('bth,hc->btc', h, params['wt'], precision=HIGHEST)
            + params['bt'].reshape(1, 1, -1))
    bd = (jnp.einsum('bth,hc->btc', h, params['wb'], precision=HIGHEST)
          + params['bb'].reshape(1, 1, -1))
    return text, bd


if __name__ == "__main__":
    # Small shapes consistent with Predictor(input_dim, hidden_dim, ker, text_class).
    B, T, Din, H, ker, Ct = 2, 16, 8, 32, 3, 10

    key = jax.random.PRNGKey(0)
    ks = jax.random.split(key, 12)
    x = jax.random.normal(ks[0], (B, T, Din), jnp.float32)

    # Deterministic synthetic parameters (shapes match the module's __init__).
    # Conv weights stored as (K, Cin, Cout) = PyTorch's (Cout, Cin, K) permuted.
    # BN gamma/beta are given non-trivial values to exercise the affine path.
    params = dict(
        w1=jax.random.normal(ks[1], (ker, Din, H), jnp.float32) * 0.1,
        g1=1.0 + 0.1 * jax.random.normal(ks[7], (1, H), jnp.float32),
        b1=0.1 * jax.random.normal(ks[8], (1, H), jnp.float32),
        w2=jax.random.normal(ks[2], (ker, H, H), jnp.float32) * 0.1,
        g2=1.0 + 0.1 * jax.random.normal(ks[9], (1, H), jnp.float32),
        b2=0.1 * jax.random.normal(ks[10], (1, H), jnp.float32),
        wt=jax.random.normal(ks[3], (H, Ct), jnp.float32) * 0.1,   # Linear(H, text_class)
        bt=jax.random.normal(ks[4], (1, Ct), jnp.float32) * 0.1,
        wb=jax.random.normal(ks[5], (H, 2), jnp.float32) * 0.1,    # Linear(H, 2)
        bb=jax.random.normal(ks[6], (1, 2), jnp.float32) * 0.1,
    )

    text_out, bd_out = jax.block_until_ready(predictor_forward(x, params, ker))

    assert text_out.shape == (B, T, Ct) and bd_out.shape == (B, T, 2)

    # Kernel uses default (bf16-pass, f32-accumulate) MXU precision; the
    # reference is fp32 HIGHEST, so the tolerance is loosened accordingly.
    text_ref, bd_ref = reference_forward(x, params, ker)
    assert jnp.allclose(text_out, text_ref, atol=5e-2, rtol=5e-2), \
        f"text max err {jnp.max(jnp.abs(text_out - text_ref))}"
    assert jnp.allclose(bd_out, bd_ref, atol=5e-2, rtol=5e-2), \
        f"bd max err {jnp.max(jnp.abs(bd_out - bd_ref))}"

    print("KERNEL_OK")
</pallas_src>

<mosaic_0001>
module attributes {stable_mosaic.version = 11 : i64} {
  func.func @_predictor_kernel(%arg0: memref<32x1xi32, #tpu.memory_space<vmem>>, %arg1: memref<32x8xf32, #tpu.memory_space<vmem>>, %arg2: memref<3x8x32xf32, #tpu.memory_space<vmem>>, %arg3: memref<1x32xf32, #tpu.memory_space<vmem>>, %arg4: memref<1x32xf32, #tpu.memory_space<vmem>>, %arg5: memref<3x32x32xf32, #tpu.memory_space<vmem>>, %arg6: memref<1x32xf32, #tpu.memory_space<vmem>>, %arg7: memref<1x32xf32, #tpu.memory_space<vmem>>, %arg8: memref<32x128xf32, #tpu.memory_space<vmem>>, %arg9: memref<1x128xf32, #tpu.memory_space<vmem>>, %arg10: memref<32x128xf32, #tpu.memory_space<vmem>>) attributes {dimension_semantics = [], scalar_prefetch = 0 : i64, scratch_operands = 0 : i64, tpu.core_type = #tpu.core_type<tc>} {
    %c0 = arith.constant 0 : index
    %c0_0 = arith.constant 0 : index
    %0 = vector.load %arg0[%c0, %c0_0] : memref<32x1xi32, #tpu.memory_space<vmem>>, vector<32x1xi32>
    %c0_1 = arith.constant 0 : index
    %c0_2 = arith.constant 0 : index
    %1 = vector.load %arg1[%c0_1, %c0_2] : memref<32x8xf32, #tpu.memory_space<vmem>>, vector<32x8xf32>
    %c1_i32 = arith.constant 1 : i32
    %2 = tpu.dynamic_rotate %1 by %c1_i32 dim 0 : vector<32x8xf32>, i32 -> vector<32x8xf32>
    %c-1_i32 = arith.constant -1 : i32
    %3 = vector.broadcast %c-1_i32 : i32 to vector<32x1xi32>
    %4 = arith.addi %0, %3 : vector<32x1xi32>
    %c0_i32 = arith.constant 0 : i32
    %5 = vector.broadcast %c0_i32 : i32 to vector<32x1xi32>
    %6 = arith.cmpi sge, %4, %5 : vector<32x1xi32>
    %c-1_i32_3 = arith.constant -1 : i32
    %7 = vector.broadcast %c-1_i32_3 : i32 to vector<32x1xi32>
    %8 = arith.addi %0, %7 : vector<32x1xi32>
    %c16_i32 = arith.constant 16 : i32
    %9 = vector.broadcast %c16_i32 : i32 to vector<32x1xi32>
    %10 = arith.cmpi slt, %8, %9 : vector<32x1xi32>
    %11 = arith.andi %6, %10 : vector<32x1xi1>
    %cst = arith.constant 0.000000e+00 : f32
    %12 = vector.shape_cast %11 : vector<32x1xi1> to vector<32x1xi1>
    %13 = vector.broadcast %12 : vector<32x1xi1> to vector<32x8xi1>
    %14 = vector.broadcast %cst : f32 to vector<32x8xf32>
    %15 = arith.select %13, %2, %14 : vector<32x8xi1>, vector<32x8xf32>
    %c0_4 = arith.constant 0 : index
    %c0_5 = arith.constant 0 : index
    %c0_6 = arith.constant 0 : index
    %16 = vector.load %arg2[%c0_4, %c0_5, %c0_6] : memref<3x8x32xf32, #tpu.memory_space<vmem>>, vector<1x8x32xf32>
    %17 = vector.shape_cast %16 : vector<1x8x32xf32> to vector<8x32xf32>
    %cst_7 = arith.constant dense<0.000000e+00> : vector<32x32xf32>
    %18 = tpu.matmul %15, %17, %cst_7 {dimension_numbers = #tpu.dot_dimension_numbers<[1], [0], [0], [1], [0, 0, 1, 1], [], []>} : vector<32x8xf32>, vector<8x32xf32>, vector<32x32xf32> -> vector<32x32xf32>
    %c1 = arith.constant 1 : index
    %c0_8 = arith.constant 0 : index
    %c0_9 = arith.constant 0 : index
    %19 = vector.load %arg2[%c1, %c0_8, %c0_9] : memref<3x8x32xf32, #tpu.memory_space<vmem>>, vector<1x8x32xf32>
    %20 = vector.shape_cast %19 : vector<1x8x32xf32> to vector<8x32xf32>
    %cst_10 = arith.constant dense<0.000000e+00> : vector<32x32xf32>
    %21 = tpu.matmul %1, %20, %cst_10 {dimension_numbers = #tpu.dot_dimension_numbers<[1], [0], [0], [1], [0, 0, 1, 1], [], []>} : vector<32x8xf32>, vector<8x32xf32>, vector<32x32xf32> -> vector<32x32xf32>
    %22 = arith.addf %18, %21 : vector<32x32xf32>
    %c31_i32 = arith.constant 31 : i32
    %23 = tpu.dynamic_rotate %1 by %c31_i32 dim 0 : vector<32x8xf32>, i32 -> vector<32x8xf32>
    %c1_i32_11 = arith.constant 1 : i32
    %24 = vector.broadcast %c1_i32_11 : i32 to vector<32x1xi32>
    %25 = arith.addi %0, %24 : vector<32x1xi32>
    %c0_i32_12 = arith.constant 0 : i32
    %26 = vector.broadcast %c0_i32_12 : i32 to vector<32x1xi32>
    %27 = arith.cmpi sge, %25, %26 : vector<32x1xi32>
    %c1_i32_13 = arith.constant 1 : i32
    %28 = vector.broadcast %c1_i32_13 : i32 to vector<32x1xi32>
    %29 = arith.addi %0, %28 : vector<32x1xi32>
    %c16_i32_14 = arith.constant 16 : i32
    %30 = vector.broadcast %c16_i32_14 : i32 to vector<32x1xi32>
    %31 = arith.cmpi slt, %29, %30 : vector<32x1xi32>
    %32 = arith.andi %27, %31 : vector<32x1xi1>
    %cst_15 = arith.constant 0.000000e+00 : f32
    %33 = vector.shape_cast %32 : vector<32x1xi1> to vector<32x1xi1>
    %34 = vector.broadcast %33 : vector<32x1xi1> to vector<32x8xi1>
    %35 = vector.broadcast %cst_15 : f32 to vector<32x8xf32>
    %36 = arith.select %34, %23, %35 : vector<32x8xi1>, vector<32x8xf32>
    %c2 = arith.constant 2 : index
    %c0_16 = arith.constant 0 : index
    %c0_17 = arith.constant 0 : index
    %37 = vector.load %arg2[%c2, %c0_16, %c0_17] : memref<3x8x32xf32, #tpu.memory_space<vmem>>, vector<1x8x32xf32>
    %38 = vector.shape_cast %37 : vector<1x8x32xf32> to vector<8x32xf32>
    %cst_18 = arith.constant dense<0.000000e+00> : vector<32x32xf32>
    %39 = tpu.matmul %36, %38, %cst_18 {dimension_numbers = #tpu.dot_dimension_numbers<[1], [0], [0], [1], [0, 0, 1, 1], [], []>} : vector<32x8xf32>, vector<8x32xf32>, vector<32x32xf32> -> vector<32x32xf32>
    %40 = arith.addf %22, %39 : vector<32x32xf32>
    %cst_19 = arith.constant dense<0.000000e+00> : vector<32xf32>
    %41 = vector.multi_reduction <add>, %40, %cst_19 [0] : vector<32x32xf32> to vector<32xf32>
    %42 = vector.shape_cast %41 : vector<32xf32> to vector<1x32xf32>
    %cst_20 = arith.constant 3.125000e-02 : f32
    %43 = vector.broadcast %cst_20 : f32 to vector<1x32xf32>
    %44 = arith.mulf %42, %43 : vector<1x32xf32>
    %45 = arith.mulf %40, %40 : vector<32x32xf32>
    %cst_21 = arith.constant dense<0.000000e+00> : vector<32xf32>
    %46 = vector.multi_reduction <add>, %45, %cst_21 [0] : vector<32x32xf32> to vector<32xf32>
    %47 = vector.shape_cast %46 : vector<32xf32> to vector<1x32xf32>
    %cst_22 = arith.constant 3.125000e-02 : f32
    %48 = vector.broadcast %cst_22 : f32 to vector<1x32xf32>
    %49 = arith.mulf %47, %48 : vector<1x32xf32>
    %50 = arith.mulf %44, %44 : vector<1x32xf32>
    %51 = arith.subf %49, %50 : vector<1x32xf32>
    %cst_23 = arith.constant 0.000000e+00 : f32
    %52 = vector.broadcast %cst_23 : f32 to vector<1x32xf32>
    %53 = arith.maximumf %51, %52 : vector<1x32xf32>
    %cst_24 = arith.constant 9.99999974E-6 : f32
    %54 = vector.broadcast %cst_24 : f32 to vector<1x32xf32>
    %55 = arith.addf %53, %54 : vector<1x32xf32>
    %56 = math.rsqrt %55 : vector<1x32xf32>
    %c0_25 = arith.constant 0 : index
    %c0_26 = arith.constant 0 : index
    %57 = vector.load %arg3[%c0_25, %c0_26] : memref<1x32xf32, #tpu.memory_space<vmem>>, vector<1x32xf32>
    %58 = arith.mulf %56, %57 : vector<1x32xf32>
    %59 = vector.broadcast %58 : vector<1x32xf32> to vector<32x32xf32>
    %60 = arith.mulf %40, %59 : vector<32x32xf32>
    %c0_27 = arith.constant 0 : index
    %c0_28 = arith.constant 0 : index
    %61 = vector.load %arg4[%c0_27, %c0_28] : memref<1x32xf32, #tpu.memory_space<vmem>>, vector<1x32xf32>
    %62 = arith.mulf %44, %58 : vector<1x32xf32>
    %63 = arith.subf %61, %62 : vector<1x32xf32>
    %64 = vector.broadcast %63 : vector<1x32xf32> to vector<32x32xf32>
    %65 = arith.addf %60, %64 : vector<32x32xf32>
    %c1_i32_29 = arith.constant 1 : i32
    %66 = tpu.dynamic_rotate %65 by %c1_i32_29 dim 0 : vector<32x32xf32>, i32 -> vector<32x32xf32>
    %c-1_i32_30 = arith.constant -1 : i32
    %67 = vector.broadcast %c-1_i32_30 : i32 to vector<32x1xi32>
    %68 = arith.addi %0, %67 : vector<32x1xi32>
    %c0_i32_31 = arith.constant 0 : i32
    %69 = vector.broadcast %c0_i32_31 : i32 to vector<32x1xi32>
    %70 = arith.cmpi sge, %68, %69 : vector<32x1xi32>
    %c-1_i32_32 = arith.constant -1 : i32
    %71 = vector.broadcast %c-1_i32_32 : i32 to vector<32x1xi32>
    %72 = arith.addi %0, %71 : vector<32x1xi32>
    %c16_i32_33 = arith.constant 16 : i32
    %73 = vector.broadcast %c16_i32_33 : i32 to vector<32x1xi32>
    %74 = arith.cmpi slt, %72, %73 : vector<32x1xi32>
    %75 = arith.andi %70, %74 : vector<32x1xi1>
    %cst_34 = arith.constant 0.000000e+00 : f32
    %76 = vector.shape_cast %75 : vector<32x1xi1> to vector<32x1xi1>
    %77 = vector.broadcast %76 : vector<32x1xi1> to vector<32x32xi1>
    %78 = vector.broadcast %cst_34 : f32 to vector<32x32xf32>
    %79 = arith.select %77, %66, %78 : vector<32x32xi1>, vector<32x32xf32>
    %c0_35 = arith.constant 0 : index
    %c0_36 = arith.constant 0 : index
    %c0_37 = arith.constant 0 : index
    %80 = vector.load %arg5[%c0_35, %c0_36, %c0_37] : memref<3x32x32xf32, #tpu.memory_space<vmem>>, vector<1x32x32xf32>
    %81 = vector.shape_cast %80 : vector<1x32x32xf32> to vector<32x32xf32>
    %cst_38 = arith.constant dense<0.000000e+00> : vector<32x32xf32>
    %82 = tpu.matmul %79, %81, %cst_38 {dimension_numbers = #tpu.dot_dimension_numbers<[1], [0], [0], [1], [0, 0, 1, 1], [], []>} : vector<32x32xf32>, vector<32x32xf32>, vector<32x32xf32> -> vector<32x32xf32>
    %c1_39 = arith.constant 1 : index
    %c0_40 = arith.constant 0 : index
    %c0_41 = arith.constant 0 : index
    %83 = vector.load %arg5[%c1_39, %c0_40, %c0_41] : memref<3x32x32xf32, #tpu.memory_space<vmem>>, vector<1x32x32xf32>
    %84 = vector.shape_cast %83 : vector<1x32x32xf32> to vector<32x32xf32>
    %cst_42 = arith.constant dense<0.000000e+00> : vector<32x32xf32>
    %85 = tpu.matmul %65, %84, %cst_42 {dimension_numbers = #tpu.dot_dimension_numbers<[1], [0], [0], [1], [0, 0, 1, 1], [], []>} : vector<32x32xf32>, vector<32x32xf32>, vector<32x32xf32> -> vector<32x32xf32>
    %86 = arith.addf %82, %85 : vector<32x32xf32>
    %c31_i32_43 = arith.constant 31 : i32
    %87 = tpu.dynamic_rotate %65 by %c31_i32_43 dim 0 : vector<32x32xf32>, i32 -> vector<32x32xf32>
    %c1_i32_44 = arith.constant 1 : i32
    %88 = vector.broadcast %c1_i32_44 : i32 to vector<32x1xi32>
    %89 = arith.addi %0, %88 : vector<32x1xi32>
    %c0_i32_45 = arith.constant 0 : i32
    %90 = vector.broadcast %c0_i32_45 : i32 to vector<32x1xi32>
    %91 = arith.cmpi sge, %89, %90 : vector<32x1xi32>
    %c1_i32_46 = arith.constant 1 : i32
    %92 = vector.broadcast %c1_i32_46 : i32 to vector<32x1xi32>
    %93 = arith.addi %0, %92 : vector<32x1xi32>
    %c16_i32_47 = arith.constant 16 : i32
    %94 = vector.broadcast %c16_i32_47 : i32 to vector<32x1xi32>
    %95 = arith.cmpi slt, %93, %94 : vector<32x1xi32>
    %96 = arith.andi %91, %95 : vector<32x1xi1>
    %cst_48 = arith.constant 0.000000e+00 : f32
    %97 = vector.shape_cast %96 : vector<32x1xi1> to vector<32x1xi1>
    %98 = vector.broadcast %97 : vector<32x1xi1> to vector<32x32xi1>
    %99 = vector.broadcast %cst_48 : f32 to vector<32x32xf32>
    %100 = arith.select %98, %87, %99 : vector<32x32xi1>, vector<32x32xf32>
    %c2_49 = arith.constant 2 : index
    %c0_50 = arith.constant 0 : index
    %c0_51 = arith.constant 0 : index
    %101 = vector.load %arg5[%c2_49, %c0_50, %c0_51] : memref<3x32x32xf32, #tpu.memory_space<vmem>>, vector<1x32x32xf32>
    %102 = vector.shape_cast %101 : vector<1x32x32xf32> to vector<32x32xf32>
    %cst_52 = arith.constant dense<0.000000e+00> : vector<32x32xf32>
    %103 = tpu.matmul %100, %102, %cst_52 {dimension_numbers = #tpu.dot_dimension_numbers<[1], [0], [0], [1], [0, 0, 1, 1], [], []>} : vector<32x32xf32>, vector<32x32xf32>, vector<32x32xf32> -> vector<32x32xf32>
    %104 = arith.addf %86, %103 : vector<32x32xf32>
    %cst_53 = arith.constant dense<0.000000e+00> : vector<32xf32>
    %105 = vector.multi_reduction <add>, %104, %cst_53 [0] : vector<32x32xf32> to vector<32xf32>
    %106 = vector.shape_cast %105 : vector<32xf32> to vector<1x32xf32>
    %cst_54 = arith.constant 3.125000e-02 : f32
    %107 = vector.broadcast %cst_54 : f32 to vector<1x32xf32>
    %108 = arith.mulf %106, %107 : vector<1x32xf32>
    %109 = arith.mulf %104, %104 : vector<32x32xf32>
    %cst_55 = arith.constant dense<0.000000e+00> : vector<32xf32>
    %110 = vector.multi_reduction <add>, %109, %cst_55 [0] : vector<32x32xf32> to vector<32xf32>
    %111 = vector.shape_cast %110 : vector<32xf32> to vector<1x32xf32>
    %cst_56 = arith.constant 3.125000e-02 : f32
    %112 = vector.broadcast %cst_56 : f32 to vector<1x32xf32>
    %113 = arith.mulf %111, %112 : vector<1x32xf32>
    %114 = arith.mulf %108, %108 : vector<1x32xf32>
    %115 = arith.subf %113, %114 : vector<1x32xf32>
    %cst_57 = arith.constant 0.000000e+00 : f32
    %116 = vector.broadcast %cst_57 : f32 to vector<1x32xf32>
    %117 = arith.maximumf %115, %116 : vector<1x32xf32>
    %cst_58 = arith.constant 9.99999974E-6 : f32
    %118 = vector.broadcast %cst_58 : f32 to vector<1x32xf32>
    %119 = arith.addf %117, %118 : vector<1x32xf32>
    %120 = math.rsqrt %119 : vector<1x32xf32>
    %c0_59 = arith.constant 0 : index
    %c0_60 = arith.constant 0 : index
    %121 = vector.load %arg6[%c0_59, %c0_60] : memref<1x32xf32, #tpu.memory_space<vmem>>, vector<1x32xf32>
    %122 = arith.mulf %120, %121 : vector<1x32xf32>
    %123 = vector.broadcast %122 : vector<1x32xf32> to vector<32x32xf32>
    %124 = arith.mulf %104, %123 : vector<32x32xf32>
    %c0_61 = arith.constant 0 : index
    %c0_62 = arith.constant 0 : index
    %125 = vector.load %arg7[%c0_61, %c0_62] : memref<1x32xf32, #tpu.memory_space<vmem>>, vector<1x32xf32>
    %126 = arith.mulf %108, %122 : vector<1x32xf32>
    %127 = arith.subf %125, %126 : vector<1x32xf32>
    %128 = vector.broadcast %127 : vector<1x32xf32> to vector<32x32xf32>
    %129 = arith.addf %124, %128 : vector<32x32xf32>
    %c0_63 = arith.constant 0 : index
    %c0_64 = arith.constant 0 : index
    %130 = vector.load %arg8[%c0_63, %c0_64] : memref<32x128xf32, #tpu.memory_space<vmem>>, vector<32x128xf32>
    %cst_65 = arith.constant dense<0.000000e+00> : vector<32x128xf32>
    %131 = tpu.matmul %129, %130, %cst_65 {dimension_numbers = #tpu.dot_dimension_numbers<[1], [0], [0], [1], [0, 0, 1, 1], [], []>} : vector<32x32xf32>, vector<32x128xf32>, vector<32x128xf32> -> vector<32x128xf32>
    %c0_66 = arith.constant 0 : index
    %c0_67 = arith.constant 0 : index
    %132 = vector.load %arg9[%c0_66, %c0_67] : memref<1x128xf32, #tpu.memory_space<vmem>>, vector<1x128xf32>
    %133 = vector.broadcast %132 : vector<1x128xf32> to vector<32x128xf32>
    %134 = arith.addf %131, %133 : vector<32x128xf32>
    %c0_68 = arith.constant 0 : index
    %c0_69 = arith.constant 0 : index
    %135 = vector.load %arg10[%c0_68, %c0_69] : memref<32x128xf32, #tpu.memory_space<vmem>>, vector<32x128xf32>
    tpu.vector_store %arg10[%c0_68, %c0_69], %134 {strides = array<i32>} : memref<32x128xf32, #tpu.memory_space<vmem>>, vector<32x128xf32>,
    return
  }
}

</mosaic_0001>

<bundles_post_ra>
// kernel: tpu_custom_call.1
= control target key start
LH: loop header
LB: loop body
LE: loop exit
PB: predicated region body
PF: predicated region fallthrough
CT: control target
= control target key end

     0   :  { %15 = vsyncpa [#allocation3], 0  ;;  %s1568_s0 = inlined_call_operand.vmem [shape: s32[32,1], index: 0, kind: input, shape index: {}]   ;;  %s1569_s1 = inlined_call_operand.vmem [shape: f32[32,8], index: 1, kind: input, shape index: {}]   ;;  %s1570_s2 = inlined_call_operand.vmem [shape: f32[3,8,32], index: 2, kind: input, shape index: {}]   ;;  %s1571_s3 = inlined_call_operand.vmem [shape: f32[1,32], index: 3, kind: input, shape index: {}]   ;;  %s1572_s4 = inlined_call_operand.vmem [shape: f32[1,32], index: 4, kind: input, shape index: {}]   ;;  %s1573_s5 = inlined_call_operand.hbm [shape: f32[3,32,32], index: 5, kind: input, shape index: {}]   ;;  %s1574_s6 = inlined_call_operand.vmem [shape: f32[1,32], index: 6, kind: input, shape index: {}]   ;;  %s1575_s7 = inlined_call_operand.vmem [shape: f32[1,32], index: 7, kind: input, shape index: {}]   ;;  %s1576_s8 = inlined_call_operand.vmem [shape: f32[32,128], index: 8, kind: input, shape index: {}]   ;;  %s1577_s9 = inlined_call_operand.vmem [shape: f32[1,128], index: 9, kind: input, shape index: {}]   ;;  %s1578_s10 = inlined_call_operand.hbm [shape: f32[32,128], index: 10, kind: output, shape index: {}]  }
   0x1   :  { %16 = vsyncpa [#allocation4], 0  ;;  %s1257_s13 = smov [#allocation2]  }
   0x2   :  { %s32_s14 = sshll.u32 %s1257_s13, 4  ;;  %s33_s14 = int_to_ptr.vmem [resolvable:$true] %s32_s14 }
   0x3   :  { %s1221_s15 = scalar_lea.vmem %s33_s14, 1536  ;;  %p1226_p1 = scmp.lt.s32.totalorder %s33_s14, %s33_s14 }
   0x4   :  { %p1222_p0 = scmp.ne.s32.totalorder %s33_s14, %s1221_s15  ;;  %p1227_p2 = scmp.lt.s32.totalorder %s1221_s15, %s1221_s15 }
   0x6   :  { %p1228_p3 = por %p1227_p2, %p1226_p1 }
   0x8   :  { %p1229_p4 = pnand %p1228_p3, %p1222_p0 }
   0xa   :  { %1232 = shalt.err (!%p1229_p4)
}
   0xb   :  { %s1258_s16 = smov 128   ;;  %s1259_s17 = smov 8  }
   0xc   :  { %38 = dma.hbm_to_vmem [thread:$0]  %s1573_s5, 1536, %s33_s14, [#allocation3], %s1258_s16, %s1258_s16, %s1259_s17  }
   0xd   :  { %1253 = dma.done.wait [#allocation3], 1536  }
   0xe   :  { %1254 = vsyncadd [#allocation3], 4294965760  ;;  %v1260_v0 = vmov 0   ;;  %v62_v1 = vlaneseq  ;;  %v50_v2 = vld [vmem:[%s1568_s0] sm:$0xff]  ;;  %v51_v3 = vld [vmem:[%s1568_s0 + $0x8] sm:$0xff]  ;;  %s1261_s11 = smov [#allocation5]  }
   0xf   :  { %1208 = vset.pattern.permute.xlu1 %v1260_v0  ;;  %1207 = vset.pattern.permute.xlu0 %v1260_v0  ;;  %v53_v4 = vld [vmem:[%s1568_s0 + $0x18] sm:$0xff]  ;;  %v316_v5 = vadd.s32 1, %v50_v2  ;;  %v69_v6 = vadd.s32 4294967295, %v50_v2  ;;  %v317_v7 = vadd.s32 1, %v51_v3  ;;  %v70_v8 = vadd.s32 4294967295, %v51_v3  ;;  %v52_v9 = vld [vmem:[%s1568_s0 + $0x10] sm:$0xff] }
  0x10   :  { %v1042_v10 = vld [vmem:[%s1570_s2 + $0x8] sm:$0xff]  ;;  %v72_v11 = vadd.s32 4294967295, %v53_v4  ;;  %v71_v12 = vadd.s32 4294967295, %v52_v9  ;;  %v319_v13 = vadd.s32 1, %v53_v4  ;;  %v1340_v14 = vshrl.u32 %v62_v1, 7  ;;  %v54_v15 = vld [vmem:[%s1569_s1] sm:$0xff] }
  0x11   :  { %1200 = vmatprep.subr.mxu1 %v1042_v10  ;;  %1120 = vmatprep.subr.mxu0 %v1042_v10  ;;  %vm320_vm0 = vcmp.ge.s32.totalorder %v316_v5, 0  ;;  %vm324_vm1 = vcmp.lt.s32.totalorder %v316_v5, 16  ;;  %vm73_vm2 = vcmp.ge.s32.totalorder %v69_v6, 0  ;;  %vm77_vm3 = vcmp.lt.s32.totalorder %v69_v6, 16  ;;  %v55_v18 = vld [vmem:[%s1569_s1 + $0x8] sm:$0xff]  ;;  %v57_v19 = vld [vmem:[%s1569_s1 + $0x18] sm:$0xff] }
  0x12   :  { %1201 = vmatpush3.msra.mxu1 %v1042_v10  ;;  %1121 = vmatpush3.msra.mxu0 %v1042_v10  ;;  %vm328_vm4 = vmand %vm320_vm0, %vm324_vm1  ;;  %vm321_vm5 = vcmp.ge.s32.totalorder %v317_v7, 0  ;;  %vm325_vm6 = vcmp.lt.s32.totalorder %v317_v7, 16  ;;  %vm74_vm7 = vcmp.ge.s32.totalorder %v70_v8, 0  ;;  %vm78_vm8 = vcmp.lt.s32.totalorder %v70_v8, 16  ;;  %v109_v21 = vld [vmem:[%s1570_s2] sm:$0xff]  ;;  %v1051_v22 = vld [vmem:[%s1570_s2 + $0x10] sm:$0xff] }
  0x13   :  { %v332_v16 = vsel %vm328_vm4, 1, %v1260_v0  ;;  %vm81_vm9 = vmand %vm73_vm2, %vm77_vm3  ;;  %vm76_vm10 = vcmp.ge.s32.totalorder %v72_v11, 0  ;;  %vm80_vm11 = vcmp.lt.s32.totalorder %v72_v11, 16  ;;  %v318_v17 = vadd.s32 1, %v52_v9  ;;  %v56_v25 = vld [vmem:[%s1569_s1 + $0x10] sm:$0xff]  ;;  %1128 = vmatprep.subr.mxu1 %v109_v21  ;;  %1136 = vmatprep.subr.mxu0 %v1051_v22  ;;  %v538_v2 = vld [vmem:[#allocation2 + $0x28] sm:$0xff] }
  0x14   :  { %337 = vperm.xlu1 %1208, %v332_v16   ;;  %v85_v20 = vsel %vm81_vm9, 1, %v1260_v0  ;;  %vm329_vm12 = vmand %vm321_vm5, %vm325_vm6  ;;  %vm75_vm13 = vcmp.ge.s32.totalorder %v71_v12, 0  ;;  %vm79_vm14 = vcmp.lt.s32.totalorder %v71_v12, 16  ;;  %vm311_vm15 = vcmp.lt.s32.totalorder %v1340_v14, 7  ;;  %v539_v1 = vld [vmem:[#allocation2 + $0x30] sm:$0xff]  ;;  %v535_v3 = vld [vmem:[#allocation2 + $0x18] sm:$0xff] }
  0x15   :  { %90 = vperm.xlu0 %1207, %v85_v20   ;;  %v333_v23 = vsel %vm329_vm12, 1, %v1260_v0  ;;  %vm82_vm0 = vmand %vm74_vm7, %vm78_vm8  ;;  %vm323_vm1 = vcmp.ge.s32.totalorder %v319_v13, 0  ;;  %vm327_vm2 = vcmp.lt.s32.totalorder %v319_v13, 16  ;;  %v307_v24 = vrot.slane %v54_v15, 1  ;;  %v537_v4 = vld [vmem:[#allocation2 + $0x20] sm:$0xff]  ;;  %v534_v5 = vld [vmem:[#allocation2 + $0x10] sm:$0xff] }
  0x16   :  { %v86_v26 = vsel %vm82_vm0, 1, %v1260_v0  ;;  %vm1369_vm3 = vmand %vm76_vm10, %vm80_vm11  ;;  %v308_v28 = vrot.slane %v55_v18, 1  ;;  %v58_v29 = vrot.slane %v54_v15, 7  ;;  %v61_v30 = vrot.slane %v57_v19, 7  ;;  %v1460_v6 = vld [vmem:[#allocation2 + $0x58] sm:$0xff]  ;;  %v533_v7 = vld [vmem:[#allocation2 + $0x8] sm:$0xff] }
  0x17   :  { %vm1375_vm4 = vmand %vm75_vm13, %vm79_vm14  ;;  %vm322_vm5 = vcmp.ge.s32.totalorder %v318_v17, 0  ;;  %vm64_vm6 = vcmp.lt.s32.totalorder %v1340_v14, 1  ;;  %v60_v32 = vrot.slane %v56_v25, 7  ;;  %vm112_vm7 = vcmask 64512   ;;  %v532_v8 = vld [vmem:[#allocation2] sm:$0xff]  ;;  %s1030_s12 = sshll.u32 %s1261_s11, 4  ;;  %s1031_s12 = int_to_ptr.vmem [resolvable:$true] %s1030_s12 }
  0x18   :  { %340 = vperm.xlu1 %1208, %v333_v23   ;;  %vm326_vm8 = vcmp.lt.s32.totalorder %v318_v17, 16  ;;  %v314_v33 = vsel %vm311_vm15, %v307_v24, %v308_v28  ;;  %v68_v34 = vsel %vm64_vm6, %v61_v30, %v58_v29  ;;  %1125 = vmatprep.mubr.msk.f32.mxu1 %vm112_vm7, %v56_v25  ;;  %v309_v35 = vrot.slane %v56_v25, 1  ;;  %vm331_vm9 = vmand %vm323_vm1, %vm327_vm2  ;;  %s1233_s13 = scalar_lea.vmem %s1031_s12, 512  ;;  %p1238_p6 = scmp.lt.s32.totalorder %s1031_s12, %s1031_s12 }
  0x19   :  { %93 = vperm.xlu0 %1207, %v86_v26   ;;  %v88_v36 = vsel %vm1369_vm3, 1, %v1260_v0  ;;  %1122 = vmatprep.mubr.msk.f32.mxu0 %vm112_vm7, %v54_v15  ;;  %v59_v37 = vrot.slane %v55_v18, 7  ;;  %v65_v38 = vsel %vm64_vm6, %v60_v32, %v61_v30  ;;  %v87_v39 = vsel %vm1375_vm4, 1, %v1260_v0  ;;  %vm330_vm10 = vmand %vm322_vm5, %vm326_vm8  ;;  %p1234_p5 = scmp.ne.s32.totalorder %s1031_s12, %s1233_s13  ;;  %p1239_p7 = scmp.lt.s32.totalorder %s1233_s13, %s1233_s13 }
  0x1a   :  { %1126 = vmatmul.mubr.msk.f32.vlgmr.msra.gmra.mxu1 %vm112_vm7, %v57_v19  ;;  %1123 = vmatmul.mubr.msk.f32.vlgmr.msra.gmra.mxu0 %vm112_vm7, %v55_v18  ;;  %v313_v40 = vsel %vm311_vm15, %v308_v28, %v309_v35  ;;  %v310_v43 = vrot.slane %v57_v19, 1  ;;  %v335_v44 = vsel %vm331_vm9, 1, %v1260_v0  ;;  %v334_v47 = vsel %vm330_vm10, 1, %v1260_v0  ;;  %v540_v0 = vld [vmem:[#allocation2 + $0x38] sm:$0xff] }
  0x1b   :  { %v67_v41 = vsel %vm64_vm6, %v58_v29, %v59_v37  ;;  %1129 = vmatpush3.msra.mxu1 %v109_v21  ;;  %1137 = vmatpush3.msra.mxu0 %v1051_v22  ;;  %v66_v42 = vsel %vm64_vm6, %v59_v37, %v60_v32  ;;  %vm459_vm4 = vcmask 261120   ;;  %p1240_p8 = por %p1239_p7, %p1238_p6 }
  0x1c   :  { %99 = vperm.xlu1 %1208, %v88_v36   ;;  %v315_v45 = vsel %vm311_vm15, %v310_v43, %v307_v24  ;;  %v312_v46 = vsel %vm311_vm15, %v309_v35, %v310_v43  ;;  %1144 = vmatprep.subr.mxu1 %v540_v0 }
  0x1d   :  { %96 = vperm.xlu0 %1207, %v87_v39   ;;  %1158 = vmatprep.subr.mxu0 %v535_v3  ;;  %p1241_p9 = pnand %p1240_p8, %p1234_p5 }
  0x20   :  { %346 = vperm.xlu1 %1208, %v335_v44  }
  0x21   :  { %343 = vperm.xlu0 %1207, %v334_v47  }
  0x8f   :  { %v1412_v48 = vpop.permute.xlu1 %337 }
  0x90   :  { %vm348_vm11 = vcmp.eq.s32.totalorder %v1412_v48, 1  ;;  %v1415_v49 = vpop.permute.xlu0 %90 }
  0x91   :  { %v352_v50 = vsel %vm348_vm11, %v314_v33, 0.0  ;;  %vm101_vm12 = vcmp.eq.s32.totalorder %v1415_v49, 1 }
  0x92   :  { %v105_v51 = vsel %vm101_vm12, %v68_v34, 0.0  ;;  %1138 = vmatprep.mubr.msk.f32.mxu0 %vm112_vm7, %v352_v50 }
  0x93   :  { %1130 = vmatprep.mubr.msk.f32.mxu1 %vm112_vm7, %v105_v51  ;;  %v1424_v52 = vpop.permute.xlu1 %340 }
  0x94   :  { %vm349_vm13 = vcmp.eq.s32.totalorder %v1424_v52, 1  ;;  %v1427_v53 = vpop.permute.xlu0 %93  ;;  %v916_v52 = vld [vmem:[%s1576_s8 + $0x18] sm:$0xff] }
  0x95   :  { %v353_v54 = vsel %vm349_vm13, %v313_v40, 0.0  ;;  %vm102_vm14 = vcmp.eq.s32.totalorder %v1427_v53, 1 }
  0x96   :  { %v106_v55 = vsel %vm102_vm14, %v67_v41, 0.0  ;;  %1139 = vmatmul.mubr.msk.f32.vlgmr.msra.gmra.mxu0 %vm112_vm7, %v353_v54 }
  0x97   :  { %1131 = vmatmul.mubr.msk.f32.vlgmr.msra.gmra.mxu1 %vm112_vm7, %v106_v55  ;;  %v1436_v56 = vpop.permute.xlu1 %99  ;;  %1159 = vmatpush3.msra.mxu0 %v535_v3 }
  0x98   :  { %vm104_vm0 = vcmp.eq.s32.totalorder %v1436_v56, 1  ;;  %v1439_v57 = vpop.permute.xlu0 %96  ;;  %1145 = vmatpush3.msra.mxu1 %v540_v0  ;;  %1160 = vmatprep.subr.mxu0 %v534_v5  ;;  %v914_v56 = vld [vmem:[%s1576_s8 + $0x8] sm:$0xff] }
  0x99   :  { %v108_v58 = vsel %vm104_vm0, %v65_v38, 0.0  ;;  %vm103_vm1 = vcmp.eq.s32.totalorder %v1439_v57, 1  ;;  %1146 = vmatprep.subr.mxu1 %v539_v1  ;;  %1161 = vmatpush3.msra.mxu0 %v534_v5 }
  0x9a   :  { %v107_v59 = vsel %vm103_vm1, %v66_v42, 0.0  ;;  %1147 = vmatpush3.msra.mxu1 %v539_v1  ;;  %1162 = vmatprep.subr.mxu0 %v533_v7 }
  0x9b   :  { %1133 = vmatprep.mubr.msk.f32.mxu1 %vm112_vm7, %v107_v59  ;;  %v1447_v60 = vpop.permute.xlu1 %346  ;;  %1148 = vmatprep.subr.mxu1 %v538_v2 }
  0x9c   :  { %vm351_vm2 = vcmp.eq.s32.totalorder %v1447_v60, 1  ;;  %1134 = vmatmul.mubr.msk.f32.gmra.mxu1 %vm112_vm7, %v108_v58  ;;  %v1451_v61 = vpop.permute.xlu0 %343  ;;  %1163 = vmatpush3.msra.mxu0 %v533_v7  ;;  %v913_v60 = vld [vmem:[%s1576_s8] sm:$0xff] }
  0x9d   :  { %v355_v62 = vsel %vm351_vm2, %v315_v45, 0.0  ;;  %vm350_vm3 = vcmp.eq.s32.totalorder %v1451_v61, 1  ;;  %1149 = vmatpush3.msra.mxu1 %v538_v2  ;;  %1164 = vmatprep.subr.mxu0 %v532_v8 }
  0x9e   :  { %v354_v63 = vsel %vm350_vm3, %v312_v46, 0.0  ;;  %1150 = vmatprep.subr.mxu1 %v537_v4  ;;  %1165 = vmatpush3.msra.mxu0 %v532_v8 }
  0x9f   :  { %1141 = vmatprep.mubr.msk.f32.mxu0 %vm112_vm7, %v354_v63  ;;  %1151 = vmatpush3.msra.mxu1 %v537_v4 }
  0xa0   :  { %1142 = vmatmul.mubr.msk.f32.gmra.mxu0 %vm112_vm7, %v355_v62  ;;  %1172 = vmatprep.subr.mxu1 %v1460_v6 }
  0xa1   :  { %1186 = vmatprep.subr.mxu0 %v916_v52 }
  0xda   :  { %v1124_v9 = vpop.f32.mrf.mxu0  ;;  %v1127_v10 = vpop.f32.mrf.mxu1 }
  0xdc   :  { %v191_v11 = vpop.f32.mrf.mxu0  ;;  %v201_v12 = vpop.f32.mrf.mxu1 }
 0x156   :  { %v1140_v15 = vpop.f32.mrf.mxu0 }
 0x157   :  { %v1132_v13 = vpop.f32.mrf.mxu1 }
 0x158   :  { %v294_v16 = vadd.f32 %v1132_v13, %v1124_v9  ;;  %v436_v19 = vpop.f32.mrf.mxu0 }
 0x159   :  { %v288_v17 = vpop.f32.mrf.mxu1 }
 0x15a   :  { %v289_v18 = vadd.f32 %v288_v17, %v191_v11  ;;  %v456_v22 = vadd.f32 %v1140_v15, %v294_v16  ;;  %v497_v11 = vld [vmem:[%s1571_s3] sm:$0x1] }
 0x15b   :  { %v507_v16 = vld [vmem:[%s1572_s4] sm:$0x1] }
 0x15c   :  { %v455_v20 = vadd.f32 %v436_v19, %v289_v18  ;;  %v1135_v21 = vpop.f32.mrf.mxu1  ;;  %v475_v27 = vmul.f32 %v456_v22, %v456_v22  ;;  %v461_v32 = vsel %vm459_vm4, %v456_v22, 0.0 }
 0x15d   :  { %v304_v25 = vadd.f32 %v1135_v21, %v1127_v10 }
 0x15e   :  { %v298_v23 = vpop.f32.mrf.mxu1  ;;  %v474_v24 = vmul.f32 %v455_v20, %v455_v20  ;;  %v460_v28 = vsel %vm459_vm4, %v455_v20, 0.0  ;;  %v479_v36 = vsel %vm459_vm4, %v475_v27, 0.0 }
 0x15f   :  { %v299_v29 = vadd.f32 %v298_v23, %v201_v12  ;;  %v462_v35 = vadd.f32 %v461_v32, %v460_v28  ;;  %v1475_v12 = vsub.s32 0, %v1340_v14  ;;  %v750_v32 = vld [vmem:[#allocation2 + $0x50] sm:$0xff] }
 0x160   :  { %v1143_v26 = vpop.f32.mrf.mxu0  ;;  %v478_v33 = vsel %vm459_vm4, %v474_v24, 0.0  ;;  %v915_v14 = vld [vmem:[%s1576_s8 + $0x10] sm:$0xff] }
 0x161   :  { %v458_v30 = vadd.f32 %v1143_v26, %v304_v25  ;;  %v480_v40 = vadd.f32 %v479_v36, %v478_v33 }
 0x162   :  { %v446_v31 = vpop.f32.mrf.mxu0 }
 0x163   :  { %v457_v34 = vadd.f32 %v446_v31, %v299_v29  ;;  %v477_v37 = vmul.f32 %v458_v30, %v458_v30  ;;  %v465_v42 = vsel %vm459_vm4, %v458_v30, 0.0 }
 0x165   :  { %v463_v38 = vsel %vm459_vm4, %v457_v34, 0.0  ;;  %v476_v39 = vmul.f32 %v457_v34, %v457_v34  ;;  %v483_v46 = vsel %vm459_vm4, %v477_v37, 0.0 }
 0x166   :  { %v464_v41 = vadd.f32 %v463_v38, %v462_v35 }
 0x167   :  { %v481_v43 = vsel %vm459_vm4, %v476_v39, 0.0 }
 0x168   :  { %v466_v44 = vadd.f32 %v465_v42, %v464_v41  ;;  %v482_v45 = vadd.f32 %v481_v43, %v480_v40  ;;  %v748_v43 = vld [vmem:[#allocation2 + $0x40] sm:$0xff] }
 0x16a   :  { %v467_v47 = vrot.slane %v466_v44, 4  ;;  %v484_v50 = vadd.f32 %v483_v46, %v482_v45 }
 0x16c   :  { %v468_v51 = vadd.f32 %v467_v47, %v466_v44  ;;  %v485_v54 = vrot.slane %v484_v50, 4 }
 0x16e   :  { %v469_v55 = vrot.slane %v468_v51, 2  ;;  %v486_v58 = vadd.f32 %v485_v54, %v484_v50 }
 0x170   :  { %v470_v59 = vadd.f32 %v469_v55, %v468_v51  ;;  %v487_v62 = vrot.slane %v486_v58, 2 }
 0x172   :  { %v471_v63 = vrot.slane %v470_v59, 1  ;;  %v488_v0 = vadd.f32 %v487_v62, %v486_v58 }
 0x174   :  { %v472_v1 = vadd.f32 %v471_v63, %v470_v59  ;;  %v489_v2 = vrot.slane %v488_v0, 1 }
 0x176   :  { %v473_v3 = vmul.f32 0.03125, %v472_v1  ;;  %v490_v4 = vadd.f32 %v489_v2, %v488_v0 }
 0x178   :  { %v491_v5 = vmul.f32 0.03125, %v490_v4  ;;  %v492_v7 = vmul.f32 %v473_v3, %v473_v3 }
 0x17a   :  { %v493_v8 = vsub.f32 %v491_v5, %v492_v7 }
 0x17c   :  { %v494_v9 = vmax.f32 %v493_v8, 0.0 }
 0x17e   :  { %v495_v10 = vadd.f32 1e-05, %v494_v9 }
 0x180   :  { %1209 = vrsqrt.f32 %v495_v10 }
 0x18d   :  { %v1210_v13 = vpop.eup %1209 }
 0x18e   :  { %v498_v15 = vmul.f32 %v1210_v13, %v497_v11 }
 0x190   :  { %v502_v17 = vrot.slane %v498_v15, %v1475_v12  ;;  %v508_v18 = vmul.f32 %v498_v15, %v473_v3 }
 0x192   :  { %v509_v19 = vsub.f32 %v507_v16, %v508_v18  ;;  %v505_v21 = vmul.f32 %v502_v17, %v457_v34  ;;  %v503_v24 = vmul.f32 %v502_v17, %v455_v20  ;;  %v504_v25 = vmul.f32 %v502_v17, %v456_v22  ;;  %v749_v22 = vld [vmem:[#allocation2 + $0x48] sm:$0xff] }
 0x193   :  { %v506_v26 = vmul.f32 %v502_v17, %v458_v30 }
 0x194   :  { %v514_v23 = vrot.slane %v509_v19, %v1475_v12 }
 0x196   :  { %v518_v27 = vadd.f32 %v514_v23, %v505_v21  ;;  %v516_v28 = vadd.f32 %v514_v23, %v503_v24  ;;  %v517_v29 = vadd.f32 %v514_v23, %v504_v25  ;;  %v519_v31 = vadd.f32 %v514_v23, %v506_v26 }
 0x198   :  { %1152 = vmatprep.mubr.msk.f32.mxu1 %vm459_vm4, %v516_v28  ;;  %v520_v33 = vrot.slane %v516_v28, 7  ;;  %v523_v35 = vrot.slane %v519_v31, 7  ;;  %v521_v36 = vrot.slane %v517_v29, 7  ;;  %v737_v37 = vrot.slane %v518_v27, 1 }
 0x199   :  { %1153 = vmatmul.mubr.msk.f32.vlgmr.msra.gmra.mxu1 %vm459_vm4, %v517_v29  ;;  %v522_v38 = vrot.slane %v518_v27, 7  ;;  %v735_v34 = vrot.slane %v516_v28, 1  ;;  %v736_v39 = vrot.slane %v517_v29, 1  ;;  %v738_v40 = vrot.slane %v519_v31, 1 }
 0x19a   :  { %1173 = vmatpush3.msra.mxu1 %v1460_v6  ;;  %1155 = vmatprep.mubr.msk.f32.mxu1 %vm459_vm4, %v518_v27  ;;  %v527_v20 = vsel %vm64_vm6, %v523_v35, %v520_v33  ;;  %v526_v30 = vsel %vm64_vm6, %v520_v33, %v521_v36 }
 0x19b   :  { %1174 = vmatprep.subr.mxu1 %v750_v32  ;;  %v528_v41 = vsel %vm101_vm12, %v527_v20, 0.0  ;;  %v529_v42 = vsel %vm102_vm14, %v526_v30, 0.0  ;;  %v525_v6 = vsel %vm64_vm6, %v521_v36, %v522_v38  ;;  %v741_v44 = vsel %vm311_vm15, %v735_v34, %v736_v39 }
 0x19c   :  { %1175 = vmatpush3.msra.mxu1 %v750_v32  ;;  %1166 = vmatprep.mubr.msk.f32.mxu0 %vm459_vm4, %v528_v41  ;;  %v740_v49 = vsel %vm311_vm15, %v736_v39, %v737_v37  ;;  %v530_v53 = vsel %vm103_vm1, %v525_v6, 0.0  ;;  %v524_v45 = vsel %vm64_vm6, %v522_v38, %v523_v35  ;;  %v739_v46 = vsel %vm311_vm15, %v737_v37, %v738_v40 }
 0x19d   :  { %1176 = vmatprep.subr.mxu1 %v749_v22  ;;  %1156 = vmatmul.mubr.msk.f32.gmra.mxu1 %vm459_vm4, %v519_v31  ;;  %v743_v47 = vsel %vm348_vm11, %v741_v44, 0.0  ;;  %v744_v50 = vsel %vm349_vm13, %v740_v49, 0.0  ;;  %v531_v57 = vsel %vm104_vm0, %v524_v45, 0.0  ;;  %v745_v51 = vsel %vm350_vm3, %v739_v46, 0.0 }
 0x19e   :  { %1167 = vmatmul.mubr.msk.f32.vlgmr.msra.gmra.mxu0 %vm459_vm4, %v529_v42  ;;  %1177 = vmatpush3.msra.mxu1 %v749_v22  ;;  %v742_v54 = vsel %vm311_vm15, %v738_v40, %v735_v34 }
 0x19f   :  { %1169 = vmatprep.mubr.msk.f32.mxu0 %vm459_vm4, %v530_v53  ;;  %1178 = vmatprep.subr.mxu1 %v748_v43  ;;  %v746_v48 = vsel %vm351_vm2, %v742_v54, 0.0 }
 0x1a0   :  { %1180 = vmatprep.mubr.msk.f32.mxu1 %vm459_vm4, %v743_v47  ;;  %1179 = vmatpush3.msra.mxu1 %v748_v43 }
 0x1a1   :  { %1181 = vmatmul.mubr.msk.f32.vlgmr.msra.gmra.mxu1 %vm459_vm4, %v744_v50  ;;  %1187 = vmatpush3.msra.mxu0 %v916_v52  ;;  %v900_v52 = vld [vmem:[%s1575_s7] sm:$0x1] }
 0x1a2   :  { %1170 = vmatmul.mubr.msk.f32.gmra.mxu0 %vm459_vm4, %v531_v57  ;;  %1183 = vmatprep.mubr.msk.f32.mxu1 %vm459_vm4, %v745_v51  ;;  %v890_v51 = vld [vmem:[%s1574_s6] sm:$0x1] }
 0x1a3   :  { %1188 = vmatprep.subr.mxu0 %v915_v14 }
 0x1a4   :  { %1189 = vmatpush3.msra.mxu0 %v915_v14 }
 0x1a5   :  { %1184 = vmatmul.mubr.msk.f32.gmra.mxu1 %vm459_vm4, %v746_v48  ;;  %1190 = vmatprep.subr.mxu0 %v914_v56 }
 0x1a6   :  { %1191 = vmatpush3.msra.mxu0 %v914_v56 }
 0x1a7   :  { %1192 = vmatprep.subr.mxu0 %v913_v60 }
 0x1a8   :  { %1193 = vmatpush3.msra.mxu0 %v913_v60 }
 0x259   :  { %v1154_v61 = vpop.f32.mrf.mxu1 }
 0x25b   :  { %v619_v55 = vpop.f32.mrf.mxu1 }
 0x25d   :  { %v1157_v58 = vpop.f32.mrf.mxu1 }
 0x25e   :  { %v1168_v59 = vpop.f32.mrf.mxu0 }
 0x25f   :  { %v629_v62 = vpop.f32.mrf.mxu1  ;;  %v722_v63 = vadd.f32 %v1168_v59, %v1154_v61 }
 0x260   :  { %v716_v0 = vpop.f32.mrf.mxu0 }
 0x261   :  { %v1182_v1 = vpop.f32.mrf.mxu1  ;;  %v717_v2 = vadd.f32 %v716_v0, %v619_v55 }
 0x262   :  { %v1171_v3 = vpop.f32.mrf.mxu0  ;;  %v850_v4 = vadd.f32 %v1182_v1, %v722_v63 }
 0x263   :  { %v830_v5 = vpop.f32.mrf.mxu1  ;;  %v732_v7 = vadd.f32 %v1171_v3, %v1157_v58 }
 0x264   :  { %v726_v8 = vpop.f32.mrf.mxu0  ;;  %v849_v9 = vadd.f32 %v830_v5, %v717_v2  ;;  %v868_v10 = vmul.f32 %v850_v4, %v850_v4  ;;  %v854_v19 = vsel %vm459_vm4, %v850_v4, 0.0 }
 0x265   :  { %v1185_v11 = vpop.f32.mrf.mxu1  ;;  %v727_v13 = vadd.f32 %v726_v8, %v629_v62 }
 0x266   :  { %v853_v15 = vsel %vm459_vm4, %v849_v9, 0.0  ;;  %v867_v16 = vmul.f32 %v849_v9, %v849_v9  ;;  %v852_v17 = vadd.f32 %v1185_v11, %v732_v7  ;;  %v872_v25 = vsel %vm459_vm4, %v868_v10, 0.0 }
 0x267   :  { %v840_v18 = vpop.f32.mrf.mxu1  ;;  %v855_v24 = vadd.f32 %v854_v19, %v853_v15 }
 0x268   :  { %v871_v21 = vsel %vm459_vm4, %v867_v16, 0.0  ;;  %v851_v23 = vadd.f32 %v840_v18, %v727_v13  ;;  %v870_v26 = vmul.f32 %v852_v17, %v852_v17  ;;  %v858_v32 = vsel %vm459_vm4, %v852_v17, 0.0 }
 0x269   :  { %v873_v29 = vadd.f32 %v872_v25, %v871_v21 }
 0x26a   :  { %v856_v27 = vsel %vm459_vm4, %v851_v23, 0.0  ;;  %v869_v28 = vmul.f32 %v851_v23, %v851_v23  ;;  %v876_v37 = vsel %vm459_vm4, %v870_v26, 0.0 }
 0x26b   :  { %v857_v31 = vadd.f32 %v856_v27, %v855_v24 }
 0x26c   :  { %v874_v33 = vsel %vm459_vm4, %v869_v28, 0.0 }
 0x26d   :  { %v859_v35 = vadd.f32 %v858_v32, %v857_v31  ;;  %v875_v36 = vadd.f32 %v874_v33, %v873_v29 }
 0x26f   :  { %v860_v38 = vrot.slane %v859_v35, 4  ;;  %v877_v34 = vadd.f32 %v876_v37, %v875_v36 }
 0x271   :  { %v861_v39 = vadd.f32 %v860_v38, %v859_v35  ;;  %v878_v20 = vrot.slane %v877_v34, 4 }
 0x273   :  { %v862_v22 = vrot.slane %v861_v39, 2  ;;  %v879_v30 = vadd.f32 %v878_v20, %v877_v34 }
 0x275   :  { %v863_v40 = vadd.f32 %v862_v22, %v861_v39  ;;  %v880_v41 = vrot.slane %v879_v30, 2 }
 0x277   :  { %v864_v42 = vrot.slane %v863_v40, 1  ;;  %v881_v6 = vadd.f32 %v880_v41, %v879_v30 }
 0x279   :  { %v865_v43 = vadd.f32 %v864_v42, %v863_v40  ;;  %v882_v44 = vrot.slane %v881_v6, 1 }
 0x27b   :  { %v866_v49 = vmul.f32 0.03125, %v865_v43  ;;  %v883_v53 = vadd.f32 %v882_v44, %v881_v6 }
 0x27d   :  { %v884_v45 = vmul.f32 0.03125, %v883_v53  ;;  %v885_v46 = vmul.f32 %v866_v49, %v866_v49 }
 0x27f   :  { %v886_v47 = vsub.f32 %v884_v45, %v885_v46 }
 0x281   :  { %v887_v50 = vmax.f32 %v886_v47, 0.0 }
 0x283   :  { %v888_v57 = vadd.f32 1e-05, %v887_v50 }
 0x285   :  { %1211 = vrsqrt.f32 %v888_v57 }
 0x292   :  { %v1212_v54 = vpop.eup %1211 }
 0x293   :  { %v891_v48 = vmul.f32 %v1212_v54, %v890_v51 }
 0x295   :  { %v895_v14 = vrot.slane %v891_v48, %v1475_v12  ;;  %v901_v56 = vmul.f32 %v891_v48, %v866_v49 }
 0x297   :  { %v902_v60 = vsub.f32 %v900_v52, %v901_v56  ;;  %v896_v55 = vmul.f32 %v895_v14, %v849_v9  ;;  %v897_v58 = vmul.f32 %v895_v14, %v850_v4  ;;  %v898_v59 = vmul.f32 %v895_v14, %v851_v23 }
 0x298   :  { %v899_v1 = vmul.f32 %v895_v14, %v852_v17 }
 0x299   :  { %v907_v61 = vrot.slane %v902_v60, %v1475_v12  ;;  %v1068_v12 = vld [vmem:[%s1577_s9] ss:$0 sm:$0xff] }
 0x29b   :  { %v909_v62 = vadd.f32 %v907_v61, %v896_v55  ;;  %v910_v63 = vadd.f32 %v907_v61, %v897_v58  ;;  %v911_v0 = vadd.f32 %v907_v61, %v898_v59  ;;  %v912_v2 = vadd.f32 %v907_v61, %v899_v1 }
 0x29d   :  { %1194 = vmatprep.mubr.msk.f32.mxu0 %vm459_vm4, %v909_v62 }
 0x29e   :  { %1195 = vmatmul.mubr.msk.f32.vlgmr.msra.gmra.mxu0 %vm459_vm4, %v910_v63 }
 0x29f   :  { %1197 = vmatprep.mubr.msk.f32.mxu0 %vm459_vm4, %v911_v0 }
 0x2a2   :  { %1198 = vmatmul.mubr.msk.f32.gmra.mxu0 %vm459_vm4, %v912_v2 }
 0x35e   :  { %v1196_v3 = vpop.f32.mrf.mxu0 }
 0x35f   :  { %v1008_v4 = vadd.f32 %v1196_v3, %v1068_v12 }
 0x360   :  { %v1002_v5 = vpop.f32.mrf.mxu0 }
 0x361   :  { %1022 = vst [vmem:[#allocation5 + $0x8] sm:$0xff] %v1008_v4  ;;  %v1003_v7 = vadd.f32 %v1068_v12, %v1002_v5 }
 0x362   :  { %v1199_v8 = vpop.f32.mrf.mxu0 }
 0x363   :  { %1021 = vst [vmem:[#allocation5] sm:$0xff] %v1003_v7  ;;  %v1018_v9 = vadd.f32 %v1199_v8, %v1068_v12 }
 0x364   :  { %v1012_v10 = vpop.f32.mrf.mxu0 }
 0x365   :  { %1024 = vst [vmem:[#allocation5 + $0x18] sm:$0xff] %v1018_v9  ;;  %v1013_v11 = vadd.f32 %v1068_v12, %v1012_v10 }
 0x367   :  { %1023 = vst [vmem:[#allocation5 + $0x10] sm:$0xff] %v1013_v11 }
 0x368   :  { %1244 = shalt.err (!%p1241_p9)
}
 0x369   :  { %1036 = dma.vmem_to_hbm [thread:$0]  %s1031_s12, 512, %s1578_s10, [#allocation4], %s1258_s16, %s1258_s16, %s1259_s17  }
 0x36a   :  { %1255 = dma.done.wait [#allocation4], 512  }
 0x36b   :  { %1256 = vsyncadd [#allocation4], 4294966784 }
 0x36c   :  { %1040 = vsyncpa [#allocation3], 1 }
 0x36d   :  { %1041 = vsyncpa [#allocation4], 1 }

</bundles_post_ra>
